<compile_context>
chip_gen: v6e
topology: v6e:2x2x1
jax: 0.10.0
libtpu: 0.0.40
codegen_flags: <defaults>
</compile_context>

<pallas_src>
import functools

import jax
import jax.numpy as jnp
from jax.experimental import pallas as pl
from jax.experimental.pallas import tpu as pltpu


# ----------------------------------------------------------------------------
# Fused kernel: streamed global-avg-pool accumulation over HW tiles, then (on the
# last HW step) channel-regroup + 1x1-conv matmul + per-sample cross-entropy.
#   x:      (bn*C, bhw) f32   streamed, HW on the lane axis (lane-dense, no sublane pad)
#   sel:    (bn, bn*C)  f32   0/1 sample-selection matrix (constant block)
#   w_rep:  (bn*C, K)   f32   conv weight tiled vertically bn times (constant block)
#   bias:   (bn, K)     f32   conv bias + pooled-Gaussian-noise logits contribution
#   labels: (bn, 1)     i32
#   outputs: logits (bn, K), per-sample CE loss (bn, 1)
#   scratch: acc (bn*C, 1) f32 — pooled-sum accumulator across the HW grid axis
# ----------------------------------------------------------------------------
def fused_aug_pool_ce_kernel(x_ref, sel_ref, wrep_ref, bias_ref, labels_ref,
                             logits_ref, loss_ref, acc_ref, *, inv_hw):
    hi = pl.program_id(1)

    @pl.when(hi == 0)
    def _init():
        acc_ref[...] = jnp.zeros_like(acc_ref)

    # lane-axis (XLU) reduce of the streamed tile into the tiny accumulator
    acc_ref[...] += jnp.sum(x_ref[...], axis=-1, keepdims=True)          # (bn*C, 1)

    @pl.when(hi == pl.num_programs(1) - 1)
    def _finalize():
        pooled_flat = acc_ref[...] * inv_hw                              # (bn*C, 1)
        # regroup channels per sample AND apply the 1x1 conv in one dot:
        #   logits[n,k] = sum_j sel[n,j] * pooled_flat[j] * w_rep[j,k]
        logits = jnp.dot(sel_ref[...], pooled_flat * wrep_ref[...],
                         preferred_element_type=jnp.float32) + bias_ref[...]
        logits_ref[...] = logits                                         # (bn, K)

        # per-sample cross-entropy (mean over batch done in the wrapper)
        m = jnp.max(logits, axis=-1, keepdims=True)
        lse = m + jnp.log(jnp.sum(jnp.exp(logits - m), axis=-1, keepdims=True))
        cls = jax.lax.broadcasted_iota(jnp.int32, logits.shape, 1)
        onehot = (cls == labels_ref[...]).astype(jnp.float32)
        target = jnp.sum(logits * onehot, axis=-1, keepdims=True)
        loss_ref[...] = lse - target                                     # (bn, 1)


# ----------------------------------------------------------------------------
# Tiling: (8,128)-legal blocks, multi-MiB x tiles, >=2 batch blocks when possible.
# ----------------------------------------------------------------------------
def _pick_blocks(N, C, HW, *, target_block_bytes):
    # batch block: bn must divide N and bn*C must be a multiple of 8 (or == N*C);
    # prefer >= 2 batch blocks so the "parallel" axis shards across TensorCores (v7x).
    legal = [bn for bn in range(1, N + 1)
             if N % bn == 0 and ((bn * C) % 8 == 0 or bn * C == N * C)]
    multi = [bn for bn in legal if N // bn >= 2]
    bn = max(multi) if multi else max(legal)

    # HW block: multiple of 128 lanes (or the full extent), exact divisor of HW,
    # sized so each streamed x block approaches target_block_bytes.
    if HW % 128 != 0:
        bhw = HW
    else:
        lanes_budget = max(128, (target_block_bytes // (bn * C * 4)) // 128 * 128)
        bhw = min(HW, lanes_budget)
        while HW % bhw != 0:
            bhw -= 128
    return bn, bhw


# ----------------------------------------------------------------------------
# Pooled Gaussian noise: mean over HW of i.i.d. N(0,1) == N(0, 1/HW).
# ----------------------------------------------------------------------------
def _pooled_gaussian_noise(sigma, std, key, N, C, HW):
    z = jax.random.normal(key, (N, C), jnp.float32)
    scale = jnp.float32(sigma) / std.reshape(1, C).astype(jnp.float32)
    return scale * z / jnp.sqrt(jnp.float32(HW))                         # (N, C)


# ----------------------------------------------------------------------------
# Wrapper — mirrors GaussianAugModel.forward: returns (loss (1,), logits (N, K))
# ----------------------------------------------------------------------------
def gaussian_aug_model_forward(params, inputs, labels, sigma=0.0, noise_key=None,
                               target_block_bytes=8 << 20,
                               vmem_limit_bytes=48 * 1024 * 1024):
    N, C, H, W = inputs.shape
    K = params["w"].shape[1]
    HW = H * W

    x2d = inputs.reshape(N * C, HW).astype(jnp.float32)   # free reshape of NCHW
    labels2d = labels.reshape(N, 1).astype(jnp.int32)

    # Gaussian augmentation folded into a per-sample bias on the logits (exact for the
    # linear GAP stand-in model).  sigma>0 decision is Python-level, as in the torch code.
    if float(sigma) > 0.0:
        if noise_key is None:
            noise_key = jax.random.PRNGKey(0)
        pooled_noise = _pooled_gaussian_noise(sigma, params["std"], noise_key, N, C, HW)
    else:
        pooled_noise = jnp.zeros((N, C), jnp.float32)
    w = params["w"].astype(jnp.float32)
    bias_full = (jnp.broadcast_to(params["b"].astype(jnp.float32), (N, K))
                 + pooled_noise @ w)                                     # (N, K)

    bn, bhw = _pick_blocks(N, C, HW, target_block_bytes=target_block_bytes)
    assert N % bn == 0 and HW % bhw == 0
    grid = (N // bn, HW // bhw)

    # constant helper operands (tiny): selection matrix and vertically tiled weight
    sel = (jnp.arange(bn * C, dtype=jnp.int32)[None, :] // C
           == jnp.arange(bn, dtype=jnp.int32)[:, None]).astype(jnp.float32)  # (bn, bn*C)
    w_rep = jnp.tile(w, (bn, 1))                                              # (bn*C, K)

    kernel = functools.partial(fused_aug_pool_ce_kernel, inv_hw=1.0 / float(HW))

    logits, losses = pl.pallas_call(
        kernel,
        out_shape=(
            jax.ShapeDtypeStruct((N, K), jnp.float32),
            jax.ShapeDtypeStruct((N, 1), jnp.float32),
        ),
        grid_spec=pltpu.PrefetchScalarGridSpec(
            num_scalar_prefetch=0,
            grid=grid,
            in_specs=[
                pl.BlockSpec((bn * C, bhw), lambda ni, hi: (ni, hi)),   # x (streamed)
                pl.BlockSpec((bn, bn * C), lambda ni, hi: (0, 0)),      # sel (const)
                pl.BlockSpec((bn * C, K), lambda ni, hi: (0, 0)),       # w_rep (const)
                pl.BlockSpec((bn, K), lambda ni, hi: (ni, 0)),          # bias + noise
                pl.BlockSpec((bn, 1), lambda ni, hi: (ni, 0)),          # labels
            ],
            out_specs=(
                pl.BlockSpec((bn, K), lambda ni, hi: (ni, 0)),          # logits
                pl.BlockSpec((bn, 1), lambda ni, hi: (ni, 0)),          # per-sample CE
            ),
            scratch_shapes=[pltpu.VMEM((bn * C, 1), jnp.float32)],      # pooled-sum acc
        ),
        compiler_params=pltpu.CompilerParams(
            dimension_semantics=("parallel", "arbitrary"),
            vmem_limit_bytes=vmem_limit_bytes,
        ),
    )(x2d, sel, w_rep, bias_full, labels2d)

    loss = jnp.mean(losses).reshape(1)                 # == torch.unsqueeze(loss, 0)
    return loss, logits


# ----------------------------------------------------------------------------
# Pure-JAX reference
# ----------------------------------------------------------------------------
def reference_forward(params, inputs, labels, pooled_noise=None):
    pooled = jnp.mean(inputs, axis=(2, 3))             # (N, C)
    if pooled_noise is not None:
        pooled = pooled + pooled_noise
    logits = pooled @ params["w"] + params["b"]        # (N, K)
    lse = jax.nn.logsumexp(logits, axis=-1)
    n = inputs.shape[0]
    loss = jnp.mean(lse - logits[jnp.arange(n), labels])
    return loss.reshape(1), logits


if __name__ == "__main__":
    key = jax.random.PRNGKey(0)
    k_x, k_w, k_b, k_lab = jax.random.split(key, 4)

    N, C, H, W, K = 2, 3, 32, 32, 8                    # HW = 1024

    x = jax.random.normal(k_x, (N, C, H, W), jnp.float32)
    labels = jax.random.randint(k_lab, (N,), 0, K, dtype=jnp.int32)
    params = {
        "std": jnp.array([0.229, 0.224, 0.225], jnp.float32).reshape(1, 3, 1, 1),
        "w": jax.random.normal(k_w, (C, K), jnp.float32) * 0.1,
        "b": jax.random.normal(k_b, (1, K), jnp.float32) * 0.01,
    }

    # sigma = 0 path: small block budget forces 2 HW tiles (exercises accumulation)
    loss0, out0 = gaussian_aug_model_forward(params, x, labels, sigma=0.0,
                                             target_block_bytes=6 * 512 * 4)
    jax.block_until_ready((loss0, out0))
    loss_ref, out_ref = reference_forward(params, x, labels)
    assert loss0.shape == (1,) and out0.shape == (N, K)
    assert jnp.allclose(out0, out_ref, atol=1e-4, rtol=1e-4)
    assert jnp.allclose(loss0, loss_ref, atol=1e-4, rtol=1e-4)

    # sigma > 0 path: pooled Gaussian noise (exact for the linear stand-in model);
    # reproduce the same noise for the reference and compare exactly.
    noise_key = jax.random.PRNGKey(123)
    loss1, out1 = gaussian_aug_model_forward(params, x, labels, sigma=0.5,
                                             noise_key=noise_key)
    jax.block_until_ready((loss1, out1))
    pn = _pooled_gaussian_noise(0.5, params["std"], noise_key, N, C, H * W)
    loss1_ref, out1_ref = reference_forward(params, x, labels, pooled_noise=pn)
    assert loss1.shape == (1,) and out1.shape == (N, K)
    assert jnp.allclose(out1, out1_ref, atol=1e-4, rtol=1e-4)
    assert jnp.allclose(loss1, loss1_ref, atol=1e-4, rtol=1e-4)
    assert not bool(jnp.allclose(out1, out0, atol=1e-6))   # noise actually applied

    # bigger batch: exercises the bn*C multiple-of-8 row blocking / default large tiles
    N2, H2, W2 = 8, 16, 16
    x2 = jax.random.normal(jax.random.PRNGKey(7), (N2, C, H2, W2), jnp.float32)
    lab2 = jax.random.randint(jax.random.PRNGKey(8), (N2,), 0, K, dtype=jnp.int32)
    loss2, out2 = gaussian_aug_model_forward(params, x2, lab2, sigma=0.0)
    jax.block_until_ready((loss2, out2))
    loss2_ref, out2_ref = reference_forward(params, x2, lab2)
    assert jnp.allclose(out2, out2_ref, atol=1e-4, rtol=1e-4)
    assert jnp.allclose(loss2, loss2_ref, atol=1e-4, rtol=1e-4)

    print("KERNEL_OK")
</pallas_src>

<mosaic_0001>
module attributes {stable_mosaic.version = 11 : i64} {
  func.func @fused_aug_pool_ce_kernel(%arg0: i32, %arg1: i32, %arg2: memref<6x512xf32, #tpu.memory_space<vmem>>, %arg3: memref<2x6xf32, #tpu.memory_space<vmem>>, %arg4: memref<6x8xf32, #tpu.memory_space<vmem>>, %arg5: memref<2x8xf32, #tpu.memory_space<vmem>>, %arg6: memref<2x1xi32, #tpu.memory_space<vmem>>, %arg7: memref<2x8xf32, #tpu.memory_space<vmem>>, %arg8: memref<2x1xf32, #tpu.memory_space<vmem>>, %arg9: memref<6x1xf32, #tpu.memory_space<vmem>>) attributes {dimension_semantics = [#tpu.dimension_semantics<parallel>, #tpu.dimension_semantics<arbitrary>], iteration_bounds = array<i64: 1, 2>, scalar_prefetch = 0 : i64, scratch_operands = 1 : i64, tpu.core_type = #tpu.core_type<tc>, window_params = [{transform_indices = @transform_0, window_bounds = array<i64: 6, 512>}, {pipeline_mode = #tpu.pipeline_mode<synchronous>, transform_indices = @transform_1, window_bounds = array<i64: 2, 6>}, {pipeline_mode = #tpu.pipeline_mode<synchronous>, transform_indices = @transform_2, window_bounds = array<i64: 6, 8>}, {transform_indices = @transform_3, window_bounds = array<i64: 2, 8>}, {transform_indices = @transform_4, window_bounds = array<i64: 2, 1>}, {transform_indices = @transform_5, window_bounds = array<i64: 2, 8>}, {transform_indices = @transform_6, window_bounds = array<i64: 2, 1>}]} {
    %c0_i32 = arith.constant 0 : i32
    %0 = arith.cmpi eq, %arg1, %c0_i32 : i32
    %1 = arith.extui %0 : i1 to i32
    %c0_i32_0 = arith.constant 0 : i32
    %2 = arith.cmpi ne, %1, %c0_i32_0 : i32
    scf.if %2 {
      %cst_7 = arith.constant 0.000000e+00 : f32
      %12 = vector.broadcast %cst_7 : f32 to vector<6x1xf32>
      %c0_8 = arith.constant 0 : index
      %c0_9 = arith.constant 0 : index
      %13 = vector.load %arg9[%c0_8, %c0_9] : memref<6x1xf32, #tpu.memory_space<vmem>>, vector<6x1xf32>
      tpu.vector_store %arg9[%c0_8, %c0_9], %12 {strides = array<i32>} : memref<6x1xf32, #tpu.memory_space<vmem>>, vector<6x1xf32>,
    } else {
    }
    %c0 = arith.constant 0 : index
    %c0_1 = arith.constant 0 : index
    %3 = vector.load %arg9[%c0, %c0_1] : memref<6x1xf32, #tpu.memory_space<vmem>>, vector<6x1xf32>
    %c0_2 = arith.constant 0 : index
    %c0_3 = arith.constant 0 : index
    %4 = vector.load %arg2[%c0_2, %c0_3] : memref<6x512xf32, #tpu.memory_space<vmem>>, vector<6x512xf32>
    %cst = arith.constant dense<0.000000e+00> : vector<6xf32>
    %5 = vector.multi_reduction <add>, %4, %cst [1] : vector<6x512xf32> to vector<6xf32>
    %6 = vector.shape_cast %5 : vector<6xf32> to vector<6x1xf32>
    %7 = arith.addf %3, %6 : vector<6x1xf32>
    %c0_4 = arith.constant 0 : index
    %c0_5 = arith.constant 0 : index
    %8 = vector.load %arg9[%c0_4, %c0_5] : memref<6x1xf32, #tpu.memory_space<vmem>>, vector<6x1xf32>
    tpu.vector_store %arg9[%c0_4, %c0_5], %7 {strides = array<i32>} : memref<6x1xf32, #tpu.memory_space<vmem>>, vector<6x1xf32>,
    %c1_i32 = arith.constant 1 : i32
    %9 = arith.cmpi eq, %arg1, %c1_i32 : i32
    %10 = arith.extui %9 : i1 to i32
    %c0_i32_6 = arith.constant 0 : i32
    %11 = arith.cmpi ne, %10, %c0_i32_6 : i32
    scf.if %11 {
      %c0_7 = arith.constant 0 : index
      %c0_8 = arith.constant 0 : index
      %12 = vector.load %arg9[%c0_7, %c0_8] : memref<6x1xf32, #tpu.memory_space<vmem>>, vector<6x1xf32>
      %cst_9 = arith.constant 9.765625E-4 : f32
      %13 = vector.broadcast %cst_9 : f32 to vector<6x1xf32>
      %14 = arith.mulf %12, %13 : vector<6x1xf32>
      %c0_10 = arith.constant 0 : index
      %c0_11 = arith.constant 0 : index
      %15 = vector.load %arg3[%c0_10, %c0_11] : memref<2x6xf32, #tpu.memory_space<vmem>>, vector<2x6xf32>
      %c0_12 = arith.constant 0 : index
      %c0_13 = arith.constant 0 : index
      %16 = vector.load %arg4[%c0_12, %c0_13] : memref<6x8xf32, #tpu.memory_space<vmem>>, vector<6x8xf32>
      %17 = vector.broadcast %14 : vector<6x1xf32> to vector<6x8xf32>
      %18 = arith.mulf %17, %16 : vector<6x8xf32>
      %cst_14 = arith.constant dense<0.000000e+00> : vector<2x8xf32>
      %19 = tpu.matmul %15, %18, %cst_14 {dimension_numbers = #tpu.dot_dimension_numbers<[1], [0], [0], [1], [0, 0, 1, 1], [], []>} : vector<2x6xf32>, vector<6x8xf32>, vector<2x8xf32> -> vector<2x8xf32>
      %c0_15 = arith.constant 0 : index
      %c0_16 = arith.constant 0 : index
      %20 = vector.load %arg5[%c0_15, %c0_16] : memref<2x8xf32, #tpu.memory_space<vmem>>, vector<2x8xf32>
      %21 = arith.addf %19, %20 : vector<2x8xf32>
      %c0_17 = arith.constant 0 : index
      %c0_18 = arith.constant 0 : index
      %22 = vector.load %arg7[%c0_17, %c0_18] : memref<2x8xf32, #tpu.memory_space<vmem>>, vector<2x8xf32>
      tpu.vector_store %arg7[%c0_17, %c0_18], %21 {strides = array<i32>} : memref<2x8xf32, #tpu.memory_space<vmem>>, vector<2x8xf32>,
      %cst_19 = arith.constant dense<0xFF800000> : vector<2xf32>
      %23 = vector.multi_reduction <maximumf>, %21, %cst_19 [1] : vector<2x8xf32> to vector<2xf32>
      %24 = vector.shape_cast %23 : vector<2xf32> to vector<2x1xf32>
      %25 = vector.broadcast %24 : vector<2x1xf32> to vector<2x8xf32>
      %26 = arith.subf %21, %25 : vector<2x8xf32>
      %27 = math.exp %26 : vector<2x8xf32>
      %cst_20 = arith.constant dense<0.000000e+00> : vector<2xf32>
      %28 = vector.multi_reduction <add>, %27, %cst_20 [1] : vector<2x8xf32> to vector<2xf32>
      %29 = vector.shape_cast %28 : vector<2xf32> to vector<2x1xf32>
      %30 = math.log %29 : vector<2x1xf32>
      %31 = arith.addf %24, %30 : vector<2x1xf32>
      %32 = tpu.iota {dimensions = array<i32: 1>} : vector<2x8xi32>
      %c0_21 = arith.constant 0 : index
      %c0_22 = arith.constant 0 : index
      %33 = vector.load %arg6[%c0_21, %c0_22] : memref<2x1xi32, #tpu.memory_space<vmem>>, vector<2x1xi32>
      %34 = vector.broadcast %33 : vector<2x1xi32> to vector<2x8xi32>
      %35 = arith.cmpi eq, %32, %34 : vector<2x8xi32>
      %36 = arith.extui %35 : vector<2x8xi1> to vector<2x8xi32>
      %37 = arith.sitofp %36 : vector<2x8xi32> to vector<2x8xf32>
      %38 = arith.mulf %21, %37 : vector<2x8xf32>
      %cst_23 = arith.constant dense<0.000000e+00> : vector<2xf32>
      %39 = vector.multi_reduction <add>, %38, %cst_23 [1] : vector<2x8xf32> to vector<2xf32>
      %40 = vector.shape_cast %39 : vector<2xf32> to vector<2x1xf32>
      %41 = arith.subf %31, %40 : vector<2x1xf32>
      %c0_24 = arith.constant 0 : index
      %c0_25 = arith.constant 0 : index
      %42 = vector.load %arg8[%c0_24, %c0_25] : memref<2x1xf32, #tpu.memory_space<vmem>>, vector<2x1xf32>
      tpu.vector_store %arg8[%c0_24, %c0_25], %41 {strides = array<i32>} : memref<2x1xf32, #tpu.memory_space<vmem>>, vector<2x1xf32>,
    } else {
    }
    return
  }
  func.func @transform_0(%arg0: i32, %arg1: i32) -> (i32, i32) {
    %c0_i32 = arith.constant 0 : i32
    return %arg0, %arg1 : i32, i32
  }
  func.func @transform_1(%arg0: i32, %arg1: i32) -> (i32, i32) {
    %c0_i32 = arith.constant 0 : i32
    %c0_i32_0 = arith.constant 0 : i32
    %c0_i32_1 = arith.constant 0 : i32
    return %c0_i32, %c0_i32_0 : i32, i32
  }
  func.func @transform_2(%arg0: i32, %arg1: i32) -> (i32, i32) {
    %c0_i32 = arith.constant 0 : i32
    %c0_i32_0 = arith.constant 0 : i32
    %c0_i32_1 = arith.constant 0 : i32
    return %c0_i32, %c0_i32_0 : i32, i32
  }
  func.func @transform_3(%arg0: i32, %arg1: i32) -> (i32, i32) {
    %c0_i32 = arith.constant 0 : i32
    %c0_i32_0 = arith.constant 0 : i32
    return %arg0, %c0_i32 : i32, i32
  }
  func.func @transform_4(%arg0: i32, %arg1: i32) -> (i32, i32) {
    %c0_i32 = arith.constant 0 : i32
    %c0_i32_0 = arith.constant 0 : i32
    return %arg0, %c0_i32 : i32, i32
  }
  func.func @transform_5(%arg0: i32, %arg1: i32) -> (i32, i32) {
    %c0_i32 = arith.constant 0 : i32
    %c0_i32_0 = arith.constant 0 : i32
    return %arg0, %c0_i32 : i32, i32
  }
  func.func @transform_6(%arg0: i32, %arg1: i32) -> (i32, i32) {
    %c0_i32 = arith.constant 0 : i32
    %c0_i32_0 = arith.constant 0 : i32
    return %arg0, %c0_i32 : i32, i32
  }
}

</mosaic_0001>

<bundles_post_ra>
// kernel: tpu_custom_call.1
= control target key start
LH: loop header
LB: loop body
LE: loop exit
PB: predicated region body
PF: predicated region fallthrough
CT: control target
= control target key end

     0   :  { %12 = vsyncpa [#allocation4], 0  ;;  %s1070_s0 = inlined_call_operand.hbm [shape: f32[6,1024], index: 0, kind: input, shape index: {}]   ;;  %s1071_s1 = inlined_call_operand.vmem [shape: f32[2,6], index: 1, kind: input, shape index: {}]   ;;  %s1072_s2 = inlined_call_operand.hbm [shape: f32[6,8], index: 2, kind: input, shape index: {}]   ;;  %s1073_s3 = inlined_call_operand.vmem [shape: f32[2,8], index: 3, kind: input, shape index: {}]   ;;  %s1074_s4 = inlined_call_operand.vmem [shape: s32[2,1], index: 4, kind: input, shape index: {}]   ;;  %s1075_s5 = inlined_call_operand.hbm [shape: f32[2,8], index: 5, kind: output, shape index: {0}]   ;;  %s1076_s6 = inlined_call_operand.vmem [shape: f32[2,1], index: 6, kind: output, shape index: {1}]  }
   0x1   :  { %14 = vsyncpa [#allocation4 + $0x1], 0 }
   0x2   :  { %15 = vsyncpa [#allocation7], 0 }
   0x3   :  { %16 = vsyncpa [#allocation5], 0  ;;  %s916_s21 = smov 0   ;;  %s918_s22 = smov 0  }
   0x4   :  { %s920_s23 = smov 0   ;;  %s922_s24 = smov 0  }
   0x5   :  { %s924_s25 = smov 0   ;;  %s926_s26 = smov 0  }
   0x6 LB: > { %s623_s27 = sadd.s32 4294967295, %s872_s26   ;;  %p56_p0 = scmp.ne.s32.totalorder %s856_s22, %s852_s21  ;;  %s872_s26 = sphi %s926_s26, %s22_s26   ;;  %s868_s25 = sphi %s924_s25, %s1087_s25   ;;  %s864_s24 = sphi %s922_s24, %s1086_s24   ;;  %s860_s23 = sphi %s920_s23, %s1085_s23   ;;  %s856_s22 = sphi %s918_s22, %s1084_s22   ;;  %s852_s21 = sphi %s916_s21, %s1083_s21  }
   0x7   : > { %p948_p1 = scmp.eq.s32.totalorder %s623_s27, 0  ;;  %p624_p2 = scmp.ge.s32.totalorder %s872_s26, 1 }
   0x8   : > { %p213_p3 = scmp.lt.s32.totalorder %s872_s26, 3  ;;  %s874_s7 = smov [#allocation6]  }
   0x9   : > { %p956_p4 = por %p948_p1, %p56_p0  ;;  %s229_s8 = sshll.u32 %s874_s7, 4  ;;  %s230_s8 = int_to_ptr.vmem [resolvable:$true] %s229_s8 }
   0xa   : > { %p960_p5 = pnand %p624_p2, %p213_p3  ;;  %s31_s10 = sadd.s32 1, %s868_s25 }
   0xb   : > { %s43_s11 = sadd.s32 1, %s860_s23  ;;  %p32_p8 = scmp.ge.s32.totalorder %s31_s10, 2 }
   0xc   : > { %p663_p6 = pneg %p960_p5  ;;  %s747_s12 = scalar_lea.vmem %s230_s8, 128 }
   0xd   : > { %p748_p10 = scmp.ne.s32.totalorder %s230_s8, %s747_s12  ;;  %p755_p13 = scmp.lt.s32.totalorder %s230_s8, %s230_s8 }
   0xe   : > { %p968_p7 = pnand %p663_p6, %p948_p1  ;;  %p756_p0 = scmp.lt.s32.totalorder %s747_s12, %s747_s12 }
  0x10   : > { %p738_p9 = pneg %p968_p7  ;;  %p757_p2 = por %p756_p0, %p755_p13 }
  0x12   : > { %p750_p11 = pnand %p748_p10, %p738_p9 }
  0x14   : > { %p751_p12 = pneg %p750_p11 }
  0x16   : > { %p758_p3 = pnand %p757_p2, %p751_p12 }
  0x18   : > { %761 = shalt.err (!%p758_p3)
}
  0x19   : > { %666 = dma.hbm_to_vmem [thread:$0]  (!%p968_p7), %s1072_s2, 128, %s230_s8, [#allocation7]  }
  0x1a   : > { %s1089_s10 = smov (%p32_p8, %s31_s10), 0  ;;  %p50_p6 = scmp.ne.s32.totalorder %s860_s23, %s856_s22 }
  0x1b   : > { %p51_p9 = scmp.eq.s32.totalorder %s872_s26, 0  ;;  %s39_s15 = ssub.s32 %s868_s25, %s1089_s10 }
  0x1c   : > { %p672_p10 = scmp.lt.s32.totalorder %s872_s26, 2  ;;  %p41_p11 = scmp.eq.s32.totalorder %s39_s15, 0 }
  0x1d   : > { %p52_p12 = por %p51_p9, %p50_p6  ;;  %s254_s16 = sand.u32 1, %s860_s23  }
  0x1e   : > { %s645_s17 = sshll.u32 %s868_s25, 9  ;;  %s629_s19 = sshll.u32 %s254_s16, 5 }
  0x1f   : > { %s992_s18 = scalar_select %p41_p11, %s860_s23, %s43_s11  }
  0x20   : > { %s266_s7 = scalar_lea.hbm %s1070_s0, %s645_s17  ;;  %s258_s9 = scalar_lea.vmem [#allocation3], %s629_s19 }
  0x21   : > { %s268_s8 = sshll.u32 %s258_s9, 4  ;;  %p997_p7 = pnand %p672_p10, %p52_p12  ;;  %s269_s8 = int_to_ptr.vmem [resolvable:$true] %s268_s8 }
  0x22   : > { %s255_s13 = scalar_lea.sflag [#allocation4], %s254_s16  ;;  %s775_s14 = scalar_lea.vmem %s269_s8, 512 }
  0x23   : > { %p764_p8 = pneg %p997_p7  ;;  %p776_p13 = scmp.ne.s32.totalorder %s269_s8, %s775_s14 }
  0x24   : > { %s875_s11 = smov [#allocation3]  }
  0x25   : > { %p778_p0 = pnand %p776_p13, %p764_p8  ;;  %s780_s15 = sshll.u32 %s875_s11, 4  ;;  %s781_s15 = int_to_ptr.vmem [resolvable:$false] %s780_s15 }
  0x26   : > { %s782_s20 = scalar_lea.vmem %s781_s15, 1024  ;;  %p783_p3 = scmp.lt.s32.totalorder %s269_s8, %s781_s15 }
  0x27   : > { %p779_p2 = pneg %p778_p0  ;;  %p784_p6 = scmp.lt.s32.totalorder %s782_s20, %s775_s14 }
  0x29   : > { %p785_p9 = por %p784_p6, %p783_p3 }
  0x2b   : > { %p786_p10 = pnand %p785_p9, %p779_p2 }
  0x2d   : > { %789 = shalt.err (!%p786_p10)
}
  0x2e   : > { %670 = dma.hbm_to_vmem [thread:$0]  (!%p997_p7), %s266_s7, 512, %s269_s8, %s255_s13  }
  0x2f   : > { %277 = sbr.rel (%p960_p5) target bundleno = 877 (0x36d), region = 40  ;;  %s279_s16 = sand.u32 (!%p960_p5), 1, %s856_s22  }
  0x30   : > { %s633_s17 = sshll.u32 (!%p960_p5), %s279_s16, 5  ;;  %s280_s19 = scalar_lea.sflag (!%p960_p5), [#allocation4], %s279_s16 }
  0x31   : > { %s283_s21 = scalar_lea.vmem (!%p960_p5), [#allocation3], %s633_s17 }
  0x34   : > { %839 = dma.done.wait (%p956_p4), %s280_s19, 512  }
  0x35   : > { %841 = vsyncadd (%p956_p4), %s280_s19, 4294966784 }
  0x36   : > { %843 = dma.done.wait (%p948_p1), [#allocation7], 128  }
  0x37   : > { %845 = vsyncadd (%p948_p1), [#allocation7], 4294967168  ;;  %p635_p11 = scmp.ne.s32.totalorder %s864_s24, 0 }
  0x39   : > { %339 = sbr.rel (%p635_p11) target bundleno = 64 (0x40), region = 52 }
  0x3e   : > { %vm340_vm0 = vcmask 5120   ;;  %v876_v0 = vmov 0.0  }
  0x3f   : > { %341 = vst.msk [vmem:[#allocation2] sm:$0x3f] %vm340_vm0, %v876_v0 }
  0x40 PF: > { %v343_v1 = vld [vmem:[%s283_s21] sm:$0x3f]  ;;  %v344_v2 = vld [vmem:[%s283_s21 + $0x8] sm:$0x3f]  ;;  %v345_v3 = vld [vmem:[%s283_s21 + $0x10] sm:$0x3f] }
  0x41   : > { %v346_v4 = vld [vmem:[%s283_s21 + $0x18] sm:$0x3f]  ;;  %vm347_vm1 = vcmask 1045504   ;;  %vm358_vm2 = vcmask 5120   ;;  %p636_p1 = scmp.ne.s32.totalorder %s864_s24, 1 }
  0x42   : > { %v348_v5 = vsel %vm347_vm1, %v343_v1, 0.0  ;;  %v349_v6 = vsel %vm347_vm1, %v344_v2, 0.0  ;;  %v351_v7 = vsel %vm347_vm1, %v345_v3, 0.0  ;;  %v353_v9 = vsel %vm347_vm1, %v346_v4, 0.0 }
  0x43   : > { %v350_v8 = vadd.f32 %v349_v6, %v348_v5 }
  0x45   : > { %v352_v10 = vadd.f32 %v351_v7, %v350_v8 }
  0x46   : > { %v342_v12 = vld [vmem:[#allocation2] sm:$0x3f] }
  0x47   : > { %v354_v11 = vadd.f32 %v353_v9, %v352_v10 }
  0x49   : > { %355 = vadd.xlane.f32.xlu0 %v354_v11 }
  0xd1   : > { %363 = sbr.rel (%p636_p1) target bundleno = 862 (0x35e), region = 56 }
  0xd2   : > { %v356_v13 = vpop.xlane.xlu0 %355 }
  0xd3   : > { %v357_v14 = vadd.f32 %v356_v13, %v342_v12 }
  0xd5   : > { %359 = vst.msk [vmem:[#allocation2] sm:$0x3f] %vm358_vm2, %v357_v14 }
  0xd6   : > { %v877_v16 = vmov 0   ;;  %v878_v18 = vmov 0.0   ;;  %vm879_vm3 = vmmov 0   ;;  %v468_v19 = vld [vmem:[%s1074_s4] sm:$0x3]  ;;  %vm375_vm4 = vcmask 48128  }
  0xd7   : > { %730 = vset.pattern.permute.xlu0 %v877_v16  ;;  %648 = vmatprep.subr.mxu0 %v878_v18  ;;  %v367_v20 = vld [vmem:[#allocation6] sm:$0x3f]  ;;  %v366_v23 = vld [vmem:[%s1071_s1] sm:$0x3]  ;;  %v466_v24 = vlaneseq  ;;  %vm452_vm6 = vcmask 58368   ;;  %vm480_vm7 = vcmask 1024  }
  0xd8   : > { %650 = vmatprep.mubr.msk.f32.mxu0 %vm879_vm3, %v878_v18  ;;  %731 = vset.pattern.permute.xlu1 %v877_v16  ;;  %v374_v27 = vld [vmem:[%s1073_s3] sm:$0x3] }
  0xd9   : > { %470 = vperm.xlu1 %731, %v468_v19   ;;  %v467_v25 = vand.u32 127, %v466_v24 }
  0xdc   : > { %v364_v15 = vld [vmem:[#allocation2] sm:$0x3f] }
  0xdd   : > { %v365_v17 = vmul.f32 0.0009765625, %v364_v15 }
  0xdf   : > { %370 = vperm.xlu0 %730, %v365_v17  }
 0x154   : > { %v471_v26 = vpop.permute.xlu1 %470 }
 0x155   : > { %vm472_vm5 = vcmp.eq.s32.totalorder %v467_v25, %v471_v26 }
 0x156   : > { %v639_v28 = vsel %vm472_vm5, 1.0, %v878_v18 }
 0x15a   : > { %v371_v21 = vpop.permute.xlu0 %370 }
 0x15b   : > { %v373_v22 = vmul.f32 %v371_v21, %v367_v20 }
 0x15d   : > { %649 = vmatpush3.msk.msra.mxu0 %vm347_vm1, %v373_v22 }
 0x15e   : > { %651 = vmatmul.mubr.msk.f32.vlgmr.msra.gmra.mxu0 %vm375_vm4, %v366_v23 }
 0x21e   : > { %v448_v29 = vpop.f32.mrf.mxu0 }
 0x21f   : > { %v449_v30 = vadd.f32 %v448_v29, %v374_v27 }
 0x220   : > { %v652_v31 = vpop.f32.mrf.mxu0 }
 0x221   : > { %v454_v32 = vsel %vm452_vm6, %v449_v30, -inf  ;;  %453 = vst.msk [vmem:[#allocation8] sm:$0x3] %vm452_vm6, %v449_v30  ;;  %v475_v33 = vmul.f32 %v639_v28, %v449_v30 }
 0x222   : > { %455 = vmax.xlane.f32.xlu0 %v454_v32 }
 0x223   : > { %v476_v34 = vsel %vm452_vm6, %v475_v33, 0.0 }
 0x226   : > { %477 = vadd.xlane.f32.xlu0 %v476_v34 }
 0x2ab   : > { %v456_v35 = vpop.xlane.xlu0 %455 }
 0x2ac   : > { %v457_v36 = vsub.f32 %v449_v30, %v456_v35 }
 0x2ae   : > { %v458_v37 = vmul.f32 1.442695, %v457_v36 }
 0x2af   : > { %v478_v44 = vpop.xlane.xlu0 %477 }
 0x2b0   : > { %732 = vpow2.f32 %v458_v37 }
 0x2bd   : > { %v733_v38 = vpop.eup %732 }
 0x2be   : > { %v460_v39 = vsel %vm452_vm6, %v733_v38, 0.0 }
 0x2bf   : > { %461 = vadd.xlane.f32.xlu1 %v460_v39 }
 0x348   : > { %v462_v40 = vpop.xlane.xlu1 %461 }
 0x349   : > { %734 = vlog2.f32 %v462_v40 }
 0x356   : > { %v735_v41 = vpop.eup %734 }
 0x357   : > { %v464_v42 = vmul.f32 0.6931472, %v735_v41 }
 0x359   : > { %v465_v43 = vadd.f32 %v464_v42, %v456_v35 }
 0x35b   : > { %v479_v45 = vsub.f32 %v465_v43, %v478_v44 }
 0x35d   : > { %481 = vst.msk [vmem:[%s1076_s6] sm:$0x3] %vm480_vm7, %v479_v45 }
 0x35e PF: > { %p1037_p4 = scmp.eq.s32.totalorder %s623_s27, 1  ;;  %s880_s14 = smov [#allocation8]  }
 0x35f   : > { %s495_s11 = sshll.u32 %s880_s14, 4  ;;  %s496_s11 = int_to_ptr.vmem [resolvable:$true] %s495_s11 }
 0x360   : > { %s790_s15 = scalar_lea.vmem %s496_s11, 32  ;;  %p797_p8 = scmp.lt.s32.totalorder %s496_s11, %s496_s11 }
 0x361   : > { %p791_p5 = scmp.ne.s32.totalorder %s496_s11, %s790_s15  ;;  %p798_p13 = scmp.lt.s32.totalorder %s790_s15, %s790_s15 }
 0x363   : > { %p792_p12 = pnand %p791_p5, %p1037_p4  ;;  %p799_p0 = por %p798_p13, %p797_p8 }
 0x365   : > { %p793_p7 = pneg %p792_p12 }
 0x367   : > { %p800_p2 = pnand %p799_p0, %p793_p7 }
 0x369   : > { %803 = shalt.err (!%p800_p2)
}
 0x36a   : > { %660 = dma.vmem_to_hbm [thread:$0]  (%p1037_p4), %s496_s11, 32, %s1075_s5, [#allocation5]  }
 0x36b   : > { %847 = dma.done.wait (%p1037_p4), [#allocation5], 32  }
 0x36c   : > { %849 = vsyncadd (%p1037_p4), [#allocation5], 4294967264 }
 0x36d PF: > { %s22_s26 = sadd.s32 1, %s872_s26   ;;  %s1083_s21 = smov %s856_s22 }
 0x36e   : > { %p19_p3 = scmp.ge.s32.totalorder %s22_s26, 4   ;;  %s1084_s22 = smov %s860_s23 }
 0x36f   : > { %s1085_s23 = smov %s992_s18  ;;  %s1086_s24 = smov %s868_s25 }
 0x370   : > { %s1087_s25 = smov %s1089_s10  ;;  %21 = sbr.rel (!%p19_p3) target bundleno = 6 (0x6), region = 108 }
 0x375   :  { %518 = vsyncpa [#allocation4], 1 }
 0x376   :  { %520 = vsyncpa [#allocation4 + $0x1], 1 }
 0x377   :  { %521 = vsyncpa [#allocation7], 1 }
 0x378   :  { %522 = vsyncpa [#allocation5], 1 }
 0x379   :  { %524 = vsyncpa [#allocation5 + $0x1], 1 }

</bundles_post_ra>
